<compile_context>
chip_gen: v6e
topology: v6e:2x2x1
jax: 0.10.0
libtpu: 0.0.40
codegen_flags: <defaults>
</compile_context>

<pallas_src>
import functools

import jax
import jax.numpy as jnp
from jax import lax
from jax.experimental import pallas as pl
from jax.experimental.pallas import tpu as pltpu


def _pick_tile(n, max_tile=128):
    """Largest tile <= max_tile that divides n and is a multiple of 8,
    or the full dim when n is small / has no such divisor."""
    if n <= max_tile:
        return n
    for t in range(max_tile, 7, -8):
        if n % t == 0:
            return t
    return n


# --------------------------- kernel 1: LayerNorm + QKV ---------------------------

def ln_qkv_kernel(x_ref, gamma_ref, beta_ref, wqkv_ref,
                  q_ref, k_ref, v_ref, *, inner, scale, eps):
    x = x_ref[0].astype(jnp.float32)                       # (TN, D), f32 elementwise math
    mean = jnp.mean(x, axis=-1, keepdims=True)
    var = jnp.mean((x - mean) ** 2, axis=-1, keepdims=True)
    xn = (x - mean) * lax.rsqrt(var + eps)
    xn = xn * gamma_ref[0] + beta_ref[0]                   # (TN, D)

    # MXU: bf16 operands, f32 accumulation.
    qkv = jnp.dot(xn.astype(jnp.bfloat16), wqkv_ref[...],
                  preferred_element_type=jnp.float32)      # (TN, 3*inner)

    # Fold the softmax scale into q (touches N*inner elements, not H*N*N).
    q_ref[0] = (qkv[:, 0 * inner:1 * inner] * scale).astype(q_ref.dtype)
    k_ref[0] = qkv[:, 1 * inner:2 * inner].astype(k_ref.dtype)
    v_ref[0] = qkv[:, 2 * inner:3 * inner].astype(v_ref.dtype)


# ---------------- kernel 2: flash attention + output projection -----------------

def flash_attn_kernel(q_ref, k_ref, v_ref, wout_ref, o_ref,
                      m_sc, l_sc, acc_sc, *, heads, dim_head):
    ki = pl.program_id(2)

    @pl.when(ki == 0)
    def _():
        m_sc[...] = jnp.full_like(m_sc, -jnp.inf)
        l_sc[...] = jnp.zeros_like(l_sc)
        acc_sc[...] = jnp.zeros_like(acc_sc)

    q = q_ref[0]            # (TQ, inner) bf16, already scaled by dim_head**-0.5
    k = k_ref[0]            # (TK, inner) bf16
    v = v_ref[0]            # (TK, inner) bf16

    # Per-head lane slices: no head transposes / reshapes (no XLU traffic).
    for h in range(heads):                                  # static unroll
        lo = h * dim_head
        qh = q[:, lo:lo + dim_head]                         # (TQ, Dh)
        kh = k[:, lo:lo + dim_head]                         # (TK, Dh)
        vh = v[:, lo:lo + dim_head]                         # (TK, Dh)

        # s = qh @ kh^T via dot_general (contract on Dh), f32 accumulation.
        s = lax.dot_general(qh, kh, (((1,), (1,)), ((), ())),
                            preferred_element_type=jnp.float32)   # (TQ, TK)

        m_prev = m_sc[h]                                          # (TQ, 1)
        m_new = jnp.maximum(m_prev, jnp.max(s, axis=-1, keepdims=True))
        alpha = jnp.exp(m_prev - m_new)                           # (TQ, 1)
        p = jnp.exp(s - m_new)                                    # (TQ, TK) f32

        l_sc[h] = alpha * l_sc[h] + jnp.sum(p, axis=-1, keepdims=True)
        pv = jnp.dot(p.astype(v.dtype), vh,
                     preferred_element_type=jnp.float32)          # (TQ, Dh)
        acc_sc[:, pl.ds(lo, dim_head)] = (
            alpha * acc_sc[:, pl.ds(lo, dim_head)] + pv)
        m_sc[h] = m_new

    @pl.when(ki == pl.num_programs(2) - 1)
    def _():
        # Normalize AFTER the PV matmul: O(N*Dh) multiplies, reciprocal on EUP.
        for h in range(heads):
            lo = h * dim_head
            inv = pl.reciprocal(l_sc[h], approx=True)             # (TQ, 1)
            acc_sc[:, pl.ds(lo, dim_head)] = acc_sc[:, pl.ds(lo, dim_head)] * inv
        out = acc_sc[...].astype(jnp.bfloat16)                    # (TQ, inner)
        o_ref[0] = jnp.dot(out, wout_ref[...],
                           preferred_element_type=jnp.float32).astype(o_ref.dtype)


# ------------------------------------ wrapper ------------------------------------

def attention_forward(x, gamma, beta, w_qkv, w_out, *, heads, dim_head,
                      q_tile=128, kv_tile=128):
    B, N, D = x.shape
    inner = heads * dim_head
    assert w_qkv.shape == (D, 3 * inner)
    assert w_out.shape == (inner, D)
    scale = dim_head ** (-0.5)

    tn = _pick_tile(N, 128)       # row tile for LN+QKV
    tq = _pick_tile(N, q_tile)    # query tile
    tk = _pick_tile(N, kv_tile)   # kv tile

    gamma2 = gamma.reshape(1, D).astype(jnp.float32)
    beta2 = beta.reshape(1, D).astype(jnp.float32)
    w_qkv_bf = w_qkv.astype(jnp.bfloat16)   # narrow MXU operands
    w_out_bf = w_out.astype(jnp.bfloat16)

    # Explicit VMEM budget: safely below v7x's 64 MiB physical and within
    # v5e/v6e 128 MiB; actual per-step working set here is tile-sized (KBs).
    vmem_limit = 48 * 1024 * 1024

    # ---- kernel 1: LayerNorm + QKV projection (weights resident, fetched once) ---
    qkv_cost = pl.CostEstimate(
        flops=2 * B * N * D * 3 * inner,
        transcendentals=B * N,
        bytes_accessed=int(x.size * x.dtype.itemsize
                           + w_qkv_bf.size * 2 + 3 * B * N * inner * 2))
    q, k, v = pl.pallas_call(
        functools.partial(ln_qkv_kernel, inner=inner, scale=scale, eps=1e-5),
        out_shape=(
            jax.ShapeDtypeStruct((B, N, inner), jnp.bfloat16),
            jax.ShapeDtypeStruct((B, N, inner), jnp.bfloat16),
            jax.ShapeDtypeStruct((B, N, inner), jnp.bfloat16),
        ),
        grid_spec=pltpu.PrefetchScalarGridSpec(
            num_scalar_prefetch=0,
            grid=(B, N // tn),
            in_specs=[
                pl.BlockSpec((1, tn, D), lambda b, i: (b, i, 0)),    # x tile
                pl.BlockSpec((1, D), lambda b, i: (0, 0)),           # gamma (resident)
                pl.BlockSpec((1, D), lambda b, i: (0, 0)),           # beta  (resident)
                pl.BlockSpec((D, 3 * inner), lambda b, i: (0, 0)),   # W_qkv (resident)
            ],
            out_specs=[
                pl.BlockSpec((1, tn, inner), lambda b, i: (b, i, 0)),
                pl.BlockSpec((1, tn, inner), lambda b, i: (b, i, 0)),
                pl.BlockSpec((1, tn, inner), lambda b, i: (b, i, 0)),
            ],
        ),
        compiler_params=pltpu.CompilerParams(
            dimension_semantics=("parallel", "parallel"),
            vmem_limit_bytes=vmem_limit),
        cost_estimate=qkv_cost,
    )(x, gamma2, beta2, w_qkv_bf)

    # ---- kernel 2: flash attention (online softmax) + output projection ----------
    attn_cost = pl.CostEstimate(
        flops=int(B * (4 * N * N * inner + 2 * N * inner * D)),
        transcendentals=int(B * heads * N * N),
        bytes_accessed=int(3 * B * N * inner * 2 + w_out_bf.size * 2
                           + B * N * D * x.dtype.itemsize))
    out = pl.pallas_call(
        functools.partial(flash_attn_kernel, heads=heads, dim_head=dim_head),
        out_shape=jax.ShapeDtypeStruct((B, N, D), x.dtype),
        grid_spec=pltpu.PrefetchScalarGridSpec(
            num_scalar_prefetch=0,
            grid=(B, N // tq, N // tk),          # KV reduction axis last
            in_specs=[
                pl.BlockSpec((1, tq, inner), lambda b, qi, ki: (b, qi, 0)),  # q
                pl.BlockSpec((1, tk, inner), lambda b, qi, ki: (b, ki, 0)),  # k
                pl.BlockSpec((1, tk, inner), lambda b, qi, ki: (b, ki, 0)),  # v
                pl.BlockSpec((inner, D), lambda b, qi, ki: (0, 0)),          # W_out
            ],
            out_specs=pl.BlockSpec((1, tq, D), lambda b, qi, ki: (b, qi, 0)),
            scratch_shapes=[
                pltpu.VMEM((heads, tq, 1), jnp.float32),   # running max per head
                pltpu.VMEM((heads, tq, 1), jnp.float32),   # running sum per head
                pltpu.VMEM((tq, inner), jnp.float32),      # output accumulator
            ],
        ),
        compiler_params=pltpu.CompilerParams(
            dimension_semantics=("parallel", "parallel", "arbitrary"),
            vmem_limit_bytes=vmem_limit),
        cost_estimate=attn_cost,
    )(q, k, v, w_out_bf)
    return out


if __name__ == "__main__":
    # Small shapes consistent with the module's forward: x: (B, N, dim)
    B, N, dim = 2, 8, 32
    heads, dim_head = 4, 8
    inner = heads * dim_head

    key = jax.random.PRNGKey(0)
    kx, kq, ko = jax.random.split(key, 3)

    x = jax.random.normal(kx, (B, N, dim), dtype=jnp.float32)

    # Deterministic parameter init (synthetic — not loaded from a checkpoint).
    gamma = jnp.ones((dim,), dtype=jnp.float32)           # LayerNorm weight
    beta = jnp.zeros((dim,), dtype=jnp.float32)           # LayerNorm bias
    # nn.Linear stores weight as (out, in); we keep the math layout (in, out).
    w_qkv = jax.random.normal(kq, (dim, 3 * inner), dtype=jnp.float32) * (dim ** -0.5)
    w_out = jax.random.normal(ko, (inner, dim), dtype=jnp.float32) * (inner ** -0.5)

    out = attention_forward(x, gamma, beta, w_qkv, w_out,
                            heads=heads, dim_head=dim_head)
    jax.block_until_ready(out)

    # Pure-JAX f32 reference of the same math (module semantics).
    def ref(x):
        mean = jnp.mean(x, axis=-1, keepdims=True)
        var = jnp.mean((x - mean) ** 2, axis=-1, keepdims=True)
        xn = (x - mean) / jnp.sqrt(var + 1e-5) * gamma + beta
        qkv = xn @ w_qkv
        q_, k_, v_ = jnp.split(qkv, 3, axis=-1)
        def split_heads(t):
            return t.reshape(B, N, heads, dim_head).transpose(0, 2, 1, 3)
        q_, k_, v_ = map(split_heads, (q_, k_, v_))
        dots = jnp.einsum('bhnd,bhmd->bhnm', q_, k_) * (dim_head ** -0.5)
        attn = jax.nn.softmax(dots, axis=-1)
        o = jnp.einsum('bhnm,bhmd->bhnd', attn, v_)
        o = o.transpose(0, 2, 1, 3).reshape(B, N, inner)
        return o @ w_out

    ref_out = ref(x)
    max_diff = jnp.max(jnp.abs(out - ref_out))
    # bf16 MXU operands + approx reciprocal -> compare at bf16-level tolerance.
    assert jnp.allclose(out, ref_out, atol=8e-2, rtol=2e-2), f"max diff {max_diff}"
    print("KERNEL_OK")
</pallas_src>

<mosaic_0001>
module attributes {stable_mosaic.version = 11 : i64} {
  func.func @ln_qkv_kernel(%arg0: i32, %arg1: i32, %arg2: memref<1x8x32xf32, #tpu.memory_space<vmem>>, %arg3: memref<1x32xf32, #tpu.memory_space<vmem>>, %arg4: memref<1x32xf32, #tpu.memory_space<vmem>>, %arg5: memref<32x96xbf16, #tpu.memory_space<vmem>>, %arg6: memref<1x8x32xbf16, #tpu.memory_space<vmem>>, %arg7: memref<1x8x32xbf16, #tpu.memory_space<vmem>>, %arg8: memref<1x8x32xbf16, #tpu.memory_space<vmem>>) attributes {dimension_semantics = [#tpu.dimension_semantics<parallel>, #tpu.dimension_semantics<parallel>], iteration_bounds = array<i64: 2, 1>, scalar_prefetch = 0 : i64, scratch_operands = 0 : i64, tpu.core_type = #tpu.core_type<tc>, window_params = [{transform_indices = @transform_0, window_bounds = array<i64: 1, 8, 32>}, {pipeline_mode = #tpu.pipeline_mode<synchronous>, transform_indices = @transform_1, window_bounds = array<i64: 1, 32>}, {pipeline_mode = #tpu.pipeline_mode<synchronous>, transform_indices = @transform_2, window_bounds = array<i64: 1, 32>}, {pipeline_mode = #tpu.pipeline_mode<synchronous>, transform_indices = @transform_3, window_bounds = array<i64: 32, 96>}, {transform_indices = @transform_4, window_bounds = array<i64: 1, 8, 32>}, {transform_indices = @transform_5, window_bounds = array<i64: 1, 8, 32>}, {transform_indices = @transform_6, window_bounds = array<i64: 1, 8, 32>}]} {
    %c0 = arith.constant 0 : index
    %c0_0 = arith.constant 0 : index
    %c0_1 = arith.constant 0 : index
    %0 = vector.load %arg2[%c0, %c0_0, %c0_1] : memref<1x8x32xf32, #tpu.memory_space<vmem>>, vector<1x8x32xf32>
    %1 = vector.shape_cast %0 : vector<1x8x32xf32> to vector<8x32xf32>
    %cst = arith.constant dense<0.000000e+00> : vector<8xf32>
    %2 = vector.multi_reduction <add>, %1, %cst [1] : vector<8x32xf32> to vector<8xf32>
    %3 = vector.shape_cast %2 : vector<8xf32> to vector<8x1xf32>
    %cst_2 = arith.constant 3.200000e+01 : f32
    %4 = vector.broadcast %cst_2 : f32 to vector<8x1xf32>
    %5 = arith.divf %3, %4 : vector<8x1xf32>
    %6 = vector.broadcast %5 : vector<8x1xf32> to vector<8x32xf32>
    %7 = arith.subf %1, %6 : vector<8x32xf32>
    %8 = arith.mulf %7, %7 : vector<8x32xf32>
    %cst_3 = arith.constant dense<0.000000e+00> : vector<8xf32>
    %9 = vector.multi_reduction <add>, %8, %cst_3 [1] : vector<8x32xf32> to vector<8xf32>
    %10 = vector.shape_cast %9 : vector<8xf32> to vector<8x1xf32>
    %cst_4 = arith.constant 3.200000e+01 : f32
    %11 = vector.broadcast %cst_4 : f32 to vector<8x1xf32>
    %12 = arith.divf %10, %11 : vector<8x1xf32>
    %13 = vector.broadcast %5 : vector<8x1xf32> to vector<8x32xf32>
    %14 = arith.subf %1, %13 : vector<8x32xf32>
    %cst_5 = arith.constant 9.99999974E-6 : f32
    %15 = vector.broadcast %cst_5 : f32 to vector<8x1xf32>
    %16 = arith.addf %12, %15 : vector<8x1xf32>
    %17 = math.rsqrt %16 : vector<8x1xf32>
    %18 = vector.broadcast %17 : vector<8x1xf32> to vector<8x32xf32>
    %19 = arith.mulf %14, %18 : vector<8x32xf32>
    %c0_6 = arith.constant 0 : index
    %c0_7 = arith.constant 0 : index
    %20 = vector.load %arg3[%c0_6, %c0_7] : memref<1x32xf32, #tpu.memory_space<vmem>>, vector<1x32xf32>
    %21 = vector.shape_cast %20 : vector<1x32xf32> to vector<32xf32>
    %22 = vector.shape_cast %21 : vector<32xf32> to vector<1x32xf32>
    %23 = vector.broadcast %22 : vector<1x32xf32> to vector<8x32xf32>
    %24 = arith.mulf %19, %23 : vector<8x32xf32>
    %c0_8 = arith.constant 0 : index
    %c0_9 = arith.constant 0 : index
    %25 = vector.load %arg4[%c0_8, %c0_9] : memref<1x32xf32, #tpu.memory_space<vmem>>, vector<1x32xf32>
    %26 = vector.shape_cast %25 : vector<1x32xf32> to vector<32xf32>
    %27 = vector.shape_cast %26 : vector<32xf32> to vector<1x32xf32>
    %28 = vector.broadcast %27 : vector<1x32xf32> to vector<8x32xf32>
    %29 = arith.addf %24, %28 : vector<8x32xf32>
    %30 = arith.truncf %29 : vector<8x32xf32> to vector<8x32xbf16>
    %c0_10 = arith.constant 0 : index
    %c0_11 = arith.constant 0 : index
    %31 = vector.load %arg5[%c0_10, %c0_11] : memref<32x96xbf16, #tpu.memory_space<vmem>>, vector<32x96xbf16>
    %cst_12 = arith.constant dense<0.000000e+00> : vector<8x96xf32>
    %32 = tpu.matmul %30, %31, %cst_12 {dimension_numbers = #tpu.dot_dimension_numbers<[1], [0], [0], [1], [0, 0, 1, 1], [], []>} : vector<8x32xbf16>, vector<32x96xbf16>, vector<8x96xf32> -> vector<8x96xf32>
    %33 = vector.extract_strided_slice %32 {offsets = [0, 0], sizes = [8, 32], strides = [1, 1]} : vector<8x96xf32> to vector<8x32xf32>
    %cst_13 = arith.constant 0.353553385 : f32
    %34 = vector.broadcast %cst_13 : f32 to vector<8x32xf32>
    %35 = arith.mulf %33, %34 : vector<8x32xf32>
    %36 = arith.truncf %35 : vector<8x32xf32> to vector<8x32xbf16>
    %c0_14 = arith.constant 0 : index
    %c0_15 = arith.constant 0 : index
    %c0_16 = arith.constant 0 : index
    %37 = vector.load %arg6[%c0_14, %c0_15, %c0_16] : memref<1x8x32xbf16, #tpu.memory_space<vmem>>, vector<1x8x32xbf16>
    %38 = vector.shape_cast %37 : vector<1x8x32xbf16> to vector<8x32xbf16>
    %39 = vector.shape_cast %36 : vector<8x32xbf16> to vector<1x8x32xbf16>
    tpu.vector_store %arg6[%c0_14, %c0_15, %c0_16], %39 {strides = array<i32>} : memref<1x8x32xbf16, #tpu.memory_space<vmem>>, vector<1x8x32xbf16>,
    %40 = vector.extract_strided_slice %32 {offsets = [0, 32], sizes = [8, 32], strides = [1, 1]} : vector<8x96xf32> to vector<8x32xf32>
    %41 = arith.truncf %40 : vector<8x32xf32> to vector<8x32xbf16>
    %c0_17 = arith.constant 0 : index
    %c0_18 = arith.constant 0 : index
    %c0_19 = arith.constant 0 : index
    %42 = vector.load %arg7[%c0_17, %c0_18, %c0_19] : memref<1x8x32xbf16, #tpu.memory_space<vmem>>, vector<1x8x32xbf16>
    %43 = vector.shape_cast %42 : vector<1x8x32xbf16> to vector<8x32xbf16>
    %44 = vector.shape_cast %41 : vector<8x32xbf16> to vector<1x8x32xbf16>
    tpu.vector_store %arg7[%c0_17, %c0_18, %c0_19], %44 {strides = array<i32>} : memref<1x8x32xbf16, #tpu.memory_space<vmem>>, vector<1x8x32xbf16>,
    %45 = vector.extract_strided_slice %32 {offsets = [0, 64], sizes = [8, 32], strides = [1, 1]} : vector<8x96xf32> to vector<8x32xf32>
    %46 = arith.truncf %45 : vector<8x32xf32> to vector<8x32xbf16>
    %c0_20 = arith.constant 0 : index
    %c0_21 = arith.constant 0 : index
    %c0_22 = arith.constant 0 : index
    %47 = vector.load %arg8[%c0_20, %c0_21, %c0_22] : memref<1x8x32xbf16, #tpu.memory_space<vmem>>, vector<1x8x32xbf16>
    %48 = vector.shape_cast %47 : vector<1x8x32xbf16> to vector<8x32xbf16>
    %49 = vector.shape_cast %46 : vector<8x32xbf16> to vector<1x8x32xbf16>
    tpu.vector_store %arg8[%c0_20, %c0_21, %c0_22], %49 {strides = array<i32>} : memref<1x8x32xbf16, #tpu.memory_space<vmem>>, vector<1x8x32xbf16>,
    return
  }
  func.func @transform_0(%arg0: i32, %arg1: i32) -> (i32, i32, i32) {
    %c0_i32 = arith.constant 0 : i32
    %c0_i32_0 = arith.constant 0 : i32
    return %arg0, %arg1, %c0_i32 : i32, i32, i32
  }
  func.func @transform_1(%arg0: i32, %arg1: i32) -> (i32, i32) {
    %c0_i32 = arith.constant 0 : i32
    %c0_i32_0 = arith.constant 0 : i32
    %c0_i32_1 = arith.constant 0 : i32
    return %c0_i32, %c0_i32_0 : i32, i32
  }
  func.func @transform_2(%arg0: i32, %arg1: i32) -> (i32, i32) {
    %c0_i32 = arith.constant 0 : i32
    %c0_i32_0 = arith.constant 0 : i32
    %c0_i32_1 = arith.constant 0 : i32
    return %c0_i32, %c0_i32_0 : i32, i32
  }
  func.func @transform_3(%arg0: i32, %arg1: i32) -> (i32, i32) {
    %c0_i32 = arith.constant 0 : i32
    %c0_i32_0 = arith.constant 0 : i32
    %c0_i32_1 = arith.constant 0 : i32
    return %c0_i32, %c0_i32_0 : i32, i32
  }
  func.func @transform_4(%arg0: i32, %arg1: i32) -> (i32, i32, i32) {
    %c0_i32 = arith.constant 0 : i32
    %c0_i32_0 = arith.constant 0 : i32
    return %arg0, %arg1, %c0_i32 : i32, i32, i32
  }
  func.func @transform_5(%arg0: i32, %arg1: i32) -> (i32, i32, i32) {
    %c0_i32 = arith.constant 0 : i32
    %c0_i32_0 = arith.constant 0 : i32
    return %arg0, %arg1, %c0_i32 : i32, i32, i32
  }
  func.func @transform_6(%arg0: i32, %arg1: i32) -> (i32, i32, i32) {
    %c0_i32 = arith.constant 0 : i32
    %c0_i32_0 = arith.constant 0 : i32
    return %arg0, %arg1, %c0_i32 : i32, i32, i32
  }
}

</mosaic_0001>

<bundles_post_ra>
// kernel: tpu_custom_call.1
= control target key start
LH: loop header
LB: loop body
LE: loop exit
PB: predicated region body
PF: predicated region fallthrough
CT: control target
= control target key end

     0   :  { %s1263_s0 = inlined_call_operand.hbm [shape: f32[2,8,32], index: 0, kind: input, shape index: {}]   ;;  %s1264_s1 = inlined_call_operand.vmem [shape: f32[1,32], index: 1, kind: input, shape index: {}]   ;;  %s1265_s2 = inlined_call_operand.vmem [shape: f32[1,32], index: 2, kind: input, shape index: {}]   ;;  %s1266_s3 = inlined_call_operand.hbm [shape: bf16[32,96], index: 3, kind: input, shape index: {}]   ;;  %s1267_s4 = inlined_call_operand.hbm [shape: bf16[2,8,32], index: 4, kind: output, shape index: {0}]   ;;  %s1268_s5 = inlined_call_operand.hbm [shape: bf16[2,8,32], index: 5, kind: output, shape index: {1}]   ;;  %s1269_s6 = inlined_call_operand.hbm [shape: bf16[2,8,32], index: 6, kind: output, shape index: {2}]  }
   0x1   :  { %1274 = sst [smem:[#allocation17_spill]] %s1266_s3 }
   0x2   :  { %12 = vsyncpa [#allocation3], 0 }
   0x3   :  { %14 = vsyncpa [#allocation3 + $0x1], 0 }
   0x4   :  { %15 = vsyncpa [#allocation6], 0 }
   0x5   :  { %16 = vsyncpa [#allocation4], 0 }
   0x6   :  { %18 = vsyncpa [#allocation4 + $0x1], 0 }
   0x7   :  { %19 = vsyncpa [#allocation9], 0 }
   0x8   :  { %21 = vsyncpa [#allocation9 + $0x1], 0  ;;  %s1010_s21 = smov 0   ;;  %s1012_s22 = smov 0  }
   0x9   :  { %s1014_s23 = smov 0   ;;  %s1016_s24 = smov 0  }
   0xa   :  { %s1018_s25 = smov 0   ;;  %s1020_s26 = smov 0  }
   0xb LB: > { %1275 = sst [smem:[#allocation15_spill]] %s958_s25  ;;  %s1041_s27 = sadd.s32 4294967295, %s962_s26   ;;  %s962_s26 = sphi %s1020_s26, %s27_s26   ;;  %s958_s25 = sphi %s1018_s25, %s1292_s25   ;;  %s954_s24 = sphi %s1016_s24, %s1291_s24   ;;  %s950_s23 = sphi %s1014_s23, %s1295_s23   ;;  %s946_s22 = sphi %s1012_s22, %s1294_s22   ;;  %s942_s21 = sphi %s1010_s21, %s1293_s21  }
   0xc   : > { %s1270_s28 = sadd.s32 4294967294, %s962_s26   ;;  %p61_p0 = scmp.ne.s32.totalorder %s946_s22, %s942_s21 }
   0xd   : > { %p1273_p1 = scmp.eq.s32.totalorder %s1041_s27, 0  ;;  %p156_p3 = scmp.eq.s32.totalorder %s1270_s28, 1 }
   0xe   : > { %p638_p5 = scmp.ge.s32.totalorder %s962_s26, 1  ;;  %p219_p7 = scmp.lt.s32.totalorder %s962_s26, 3 }
   0xf   : > { %p1052_p4 = por %p1273_p1, %p61_p0  ;;  %p1057_p6 = por %p156_p3, %p61_p0 }
  0x10   : > { %p1062_p8 = pnand %p638_p5, %p219_p7  ;;  %s964_s8 = smov [#allocation5]  }
  0x11   : > { %s1277_s30 = scalar_select %p1057_p6, 1, 0 }
  0x12   : > { %s237_s9 = sshll.u32 %s964_s8, 4  ;;  %p687_p9 = pneg %p1062_p8  ;;  %s238_s9 = int_to_ptr.vmem [resolvable:$true] %s237_s9 }
  0x13   : > { %s39_s11 = sadd.s32 1, %s958_s25  ;;  %s779_s12 = scalar_lea.vmem %s238_s9, 256 }
  0x14   : > { %p1071_p11 = pnand %p687_p9, %p1273_p1  ;;  %p780_p13 = scmp.ne.s32.totalorder %s238_s9, %s779_s12 }
  0x15   : > { %p787_p5 = scmp.lt.s32.totalorder %s238_s9, %s238_s9  ;;  %p788_p7 = scmp.lt.s32.totalorder %s779_s12, %s779_s12 }
  0x16   : > { %p770_p12 = pneg %p1071_p11 }
  0x17   : > { %p789_p2 = por %p788_p7, %p787_p5 }
  0x18   : > { %p782_p0 = pnand %p780_p13, %p770_p12 }
  0x1a   : > { %p783_p3 = pneg %p782_p0 }
  0x1c   : > { %p790_p6 = pnand %p789_p2, %p783_p3 }
  0x1e   : > { %793 = shalt.err (!%p790_p6)
}
  0x1f   : > { %s965_s13 = smov 64   ;;  %s966_s14 = smov 4  }
  0x20   : > { %s1280_s3 = sld [smem:[#allocation17_spill]]  ;;  %p41_p2 = scmp.ge.s32.totalorder %s39_s11, 2 }
  0x21   : > { %s48_s17 = sadd.s32 1, %s950_s23  ;;  %p55_p6 = scmp.ne.s32.totalorder %s950_s23, %s946_s22 }
  0x22   : > { %p56_p9 = scmp.eq.s32.totalorder %s962_s26, 0  ;;  %s1297_s11 = smov (%p41_p2, %s39_s11), 0 }
  0x23   : > { %1281 = sst [smem:[#allocation16_spill]] %s1297_s11  ;;  %p1283_p13 = scmp.eq.s32.totalorder %s1041_s27, 1 }
  0x24   : > { %p1089_p12 = por %p56_p9, %p55_p6  ;;  %s43_s20 = ssub.s32 %s958_s25, %s1297_s11 }
  0x25   : > { %p1095_p0 = por %p1283_p13, %p55_p6  ;;  %p706_p3 = scmp.lt.s32.totalorder %s962_s26, 2 }
  0x26   : > { %690 = dma.hbm_to_vmem [thread:$0]  (!%p1071_p11), %s1280_s3, 256, %s238_s9, [#allocation6], %s965_s13, %s965_s13, %s966_s14  }
  0x27   : > { %p46_p11 = scmp.eq.s32.totalorder %s43_s20, 0  ;;  %s251_s8 = sand.u32 1, %s950_s23  }
  0x28   : > { %s641_s9 = sshll.u32 %s251_s8, 3  ;;  %s642_s12 = sshll.u32 %s958_s25, 7 }
  0x29   : > { %s1104_s10 = scalar_select %p46_p11, %s950_s23, %s48_s17  }
  0x2a   : > { %s261_s15 = scalar_lea.hbm %s1263_s0, %s642_s12  ;;  %s255_s16 = scalar_lea.vmem [#allocation2], %s641_s9 }
  0x2b   : > { %s263_s28 = sshll.u32 %s255_s16, 4  ;;  %p1112_p5 = pnand %p706_p3, %p1089_p12  ;;  %s264_s28 = int_to_ptr.vmem [resolvable:$true] %s263_s28 }
  0x2c   : > { %s252_s11 = scalar_lea.sflag [#allocation3], %s251_s8  ;;  %s807_s20 = scalar_lea.vmem %s264_s28, 128 }
  0x2d   : > { %p796_p7 = pneg %p1112_p5  ;;  %p808_p2 = scmp.ne.s32.totalorder %s264_s28, %s807_s20 }
  0x2e   : > { %s967_s17 = smov [#allocation2]  }
  0x2f   : > { %p810_p6 = pnand %p808_p2, %p796_p7  ;;  %s812_s25 = sshll.u32 %s967_s17, 4  ;;  %s813_s25 = int_to_ptr.vmem [resolvable:$false] %s812_s25 }
  0x30   : > { %s814_s12 = scalar_lea.vmem %s813_s25, 256  ;;  %p815_p13 = scmp.lt.s32.totalorder %s264_s28, %s813_s25 }
  0x31   : > { %p811_p9 = pneg %p810_p6  ;;  %p816_p11 = scmp.lt.s32.totalorder %s814_s12, %s807_s20 }
  0x33   : > { %p817_p10 = por %p816_p11, %p815_p13 }
  0x35   : > { %p818_p1 = pnand %p817_p10, %p811_p9 }
  0x37   : > { %821 = shalt.err (!%p818_p1)
}
  0x38   : > { %694 = dma.hbm_to_vmem [thread:$0]  (!%p1112_p5), %s261_s15, 128, %s264_s28, %s252_s11  }
  0x39   : > { %272 = sbr.rel (%p1062_p8) target bundleno = 722 (0x2d2), region = 36  ;;  %s1123_s18 = sand.u32 (!%p1062_p8), 1, %s946_s22  }
  0x3a   : > { %s644_s8 = sshll.u32 (!%p1062_p8), %s1123_s18, 3  ;;  %s275_s9 = scalar_lea.sflag (!%p1062_p8), [#allocation3], %s1123_s18 }
  0x3b   : > { %s278_s13 = scalar_lea.vmem (!%p1062_p8), [#allocation2], %s644_s8 }
  0x3e   : > { %925 = dma.done.wait (%p1052_p4), %s275_s9, 128  }
  0x3f   : > { %927 = vsyncadd (%p1052_p4), %s275_s9, 4294967168  ;;  %p1286_p1 = scmp.eq.s32.totalorder %s1041_s27, 0 }
  0x41   : > { %929 = dma.done.wait (%p1286_p1), [#allocation6], 256   ;;  %p1287_p10 = pmov %p1286_p1 }
  0x42   : > { %vm323_vm0 = vcmask 261120   ;;  %v322_v0 = vld [vmem:[%s278_s13] sm:$0xff]  ;;  %v764_v7 = vld [vmem:[#allocation5 + $0x8] sm:$0xff]   ;;  %v968_v8 = vmov 0.0   ;;  %vm969_vm1 = vmmov 0   ;;  %v765_v9 = vld [vmem:[#allocation5] sm:$0xff]  }
  0x43   : > { %931 = vsyncadd (%p1287_p10), [#allocation6], 4294967040  ;;  %v324_v1 = vsel %vm323_vm0, %v322_v0, 0.0  ;;  %667 = vmatprep.subr.bf16.mxu0 %v968_v8  ;;  %671 = vmatprep.mubr.msk.bf16.mxu0 %vm969_vm1, %v968_v8  ;;  %v649_v14 = vld [vmem:[%s1264_s1] ss:$0 sm:$0xff]  ;;  %s1145_s7 = sshll.u32 %s1123_s18, 2 }
  0x44   : > { %325 = vadd.xlane.f32.xlu0 %v324_v1  ;;  %668 = vmatpush3.bf16.msra.mxu0 %v764_v7  ;;  %v650_v16 = vld [vmem:[%s1265_s2] ss:$0 sm:$0xff]  ;;  %s1148_s11 = sshll.u32 %s954_s24, 6  ;;  %s306_s14 = scalar_lea.vmem [#allocation7], %s1145_s7  ;;  %vm416_vm2 = vcmask 257024  }
  0x45   : > { %669 = vmatprep.subr.bf16.mxu0 %v968_v8  ;;  %s455_s15 = sshll.u32 %s306_s14, 4  ;;  %s970_s16 = smov 96   ;;  %s1157_s15 = int_to_ptr.vmem [resolvable:$true] %s455_s15 }
  0x46   : > { %s1155_s12 = scalar_lea.hbm %s1267_s4, %s1148_s11  ;;  %s431_s24 = scalar_lea.sflag [#allocation4], %s1123_s18 }
  0x47   : > { %s822_s8 = scalar_lea.vmem %s1157_s15, 64  ;;  %s971_s9 = smov [#allocation7]  }
  0x48   : > { %670 = vmatpush3.bf16.msra.mxu0 %v765_v9  ;;  %p823_p4 = scmp.ne.s32.totalorder %s1157_s15, %s822_s8  ;;  %s826_s13 = sshll.u32 %s971_s9, 4  ;;  %s827_s13 = int_to_ptr.vmem [resolvable:$false] %s826_s13 }
  0x49   : > { %s828_s3 = scalar_lea.vmem %s827_s13, 128  ;;  %p829_p3 = scmp.lt.s32.totalorder %s1157_s15, %s827_s13 }
  0x4a   : > { %p824_p8 = pnand %p823_p4, %p1095_p0  ;;  %p830_p5 = scmp.lt.s32.totalorder %s828_s3, %s822_s8 }
  0x4c   : > { %p825_p12 = pneg %p824_p8  ;;  %p831_p7 = por %p830_p5, %p829_p3 }
  0x4e   : > { %p832_p2 = pnand %p831_p7, %p825_p12 }
  0xcd   : > { %v326_v2 = vpop.xlane.xlu0 %325 }
  0xce   : > { %v328_v3 = vmul.f32 0.03125, %v326_v2 }
  0xd0   : > { %v329_v4 = vsub.f32 %v322_v0, %v328_v3 }
  0xd2   : > { %v330_v5 = vmul.f32 %v329_v4, %v329_v4 }
  0xd4   : > { %v331_v6 = vsel %vm323_vm0, %v330_v5, 0.0 }
  0xd5   : > { %332 = vadd.xlane.f32.xlu0 %v331_v6 }
 0x15e   : > { %v333_v10 = vpop.xlane.xlu0 %332 }
 0x15f   : > { %v334_v11 = vmul.f32 0.03125, %v333_v10 }
 0x161   : > { %v335_v12 = vadd.f32 1e-05, %v334_v11 }
 0x163   : > { %766 = vrsqrt.f32 %v335_v12 }
 0x170   : > { %v767_v13 = vpop.eup %766 }
 0x171   : > { %v337_v15 = vmul.f32 %v767_v13, %v329_v4 }
 0x173   : > { %v345_v17 = vmul.f32 %v649_v14, %v337_v15 }
 0x175   : > { %v353_v18 = vadd.f32 %v650_v16, %v345_v17 }
 0x177   : > { %v354_v19 = vpack.c.bf16 %v353_v18, %v353_v18 }
 0x179   : > { %672 = vmatmul.mubr.msk.bf16.vlgmr.msra.gmra.mxu0 %vm323_vm0, %v354_v19 }
 0x239   : > { %v408_v20 = vpop.f32.mrf.mxu0 }
 0x23a   : > { %v414_v21 = vmul.f32 0.35355338, %v408_v20  ;;  %v663_v22 = vpack.c.bf16 %v408_v20, %v408_v20 }
 0x23b   : > { %v673_v23 = vpop.f32.mrf.mxu0 }
 0x23c   : > { %v415_v24 = vpack.c.bf16 %v414_v21, %v414_v21  ;;  %422 = vrot.lane.b32.xlu1 %v663_v22, %s970_s16 }
 0x23d   : > { %v411_v25 = vpop.f32.mrf.mxu0 }
 0x23e   : > { %417 = vst.msk [vmem:[%s306_s14] sm:$0xf] %vm416_vm2, %v415_v24 }
 0x23f   : > { %v674_v26 = vpop.f32.mrf.mxu0 }
 0x240   : > { %835 = shalt.err (!%p832_p2)
}
 0x241   : > { %s836_s25 = scalar_lea.hbm %s1155_s12, 64  ;;  %s840_s29 = scalar_lea.hbm %s1267_s4, 128 }
 0x242   : > { %p837_p6 = scmp.ne.s32.totalorder %s1155_s12, %s836_s25  ;;  %p841_p11 = scmp.lt.s32.totalorder %s1155_s12, %s1267_s4 }
 0x243   : > { %p842_p1 = scmp.lt.s32.totalorder %s840_s29, %s836_s25 }
 0x244   : > { %p838_p9 = pnand %p837_p6, %p1095_p0 }
 0x245   : > { %p843_p10 = por %p842_p1, %p841_p11 }
 0x246   : > { %p839_p13 = pneg %p838_p9 }
 0x248   : > { %p844_p4 = pnand %p843_p10, %p839_p13 }
 0x24a   : > { %847 = shalt.err (!%p844_p4)
}
 0x24b   : > { %681 = dma.vmem_to_hbm [thread:$0]  (%p1095_p0), %s1157_s15, 64, %s1155_s12, %s431_s24  }
 0x24c   : > { %s972_s20 = smov 64   ;;  %s435_s17 = sand.u32 1, %s1041_s27  }
 0x24d   : > { %426 = vrot.lane.b32.xlu1 %v663_v22, %s972_s20  ;;  %s313_s8 = scalar_lea.vmem [#allocation8], %s1145_s7  ;;  %s1187_s25 = scalar_lea.hbm %s1268_s5, %s1148_s11 }
 0x24e   : > { %s469_s9 = sshll.u32 %s313_s8, 4  ;;  %s320_s18 = scalar_lea.vmem [#allocation10], %s1145_s7  ;;  %s1189_s9 = int_to_ptr.vmem [resolvable:$true] %s469_s9 }
 0x24f   : > { %s483_s28 = sshll.u32 %s320_s18, 4  ;;  %s1195_s15 = scalar_lea.sflag [#allocation9], %s435_s17  ;;  %s484_s28 = int_to_ptr.vmem [resolvable:$true] %s483_s28 }
 0x250   : > { %s848_s27 = scalar_lea.vmem %s1189_s9, 64  ;;  %s973_s12 = smov [#allocation8]  }
 0x251   : > { %p849_p8 = scmp.ne.s32.totalorder %s1189_s9, %s848_s27  ;;  %s852_s24 = sshll.u32 %s973_s12, 4  ;;  %s853_s24 = int_to_ptr.vmem [resolvable:$false] %s852_s24 }
 0x252   : > { %s854_s29 = scalar_lea.vmem %s853_s24, 128  ;;  %p855_p5 = scmp.lt.s32.totalorder %s1189_s9, %s853_s24 }
 0x253   : > { %p850_p12 = pnand %p849_p8, %p1095_p0  ;;  %p856_p7 = scmp.lt.s32.totalorder %s854_s29, %s848_s27 }
 0x255   : > { %p851_p3 = pneg %p850_p12  ;;  %p857_p2 = por %p856_p7, %p855_p5 }
 0x257   : > { %p858_p6 = pnand %p857_p2, %p851_p3 }
 0x2ae   : > { %v423_v27 = vpop.permute.xlu1 %422 }
 0x2af   : > { %425 = vst.msk [vmem:[%s313_s8] sm:$0xf] %vm416_vm2, %v423_v27 }
 0x2b0   : > { %861 = shalt.err (!%p858_p6)
}
 0x2b1   : > { %s862_s14 = scalar_lea.hbm %s1187_s25, 64  ;;  %s866_s17 = scalar_lea.hbm %s1268_s5, 128 }
 0x2b2   : > { %p863_p9 = scmp.ne.s32.totalorder %s1187_s25, %s862_s14  ;;  %p867_p1 = scmp.lt.s32.totalorder %s1187_s25, %s1268_s5 }
 0x2b3   : > { %p868_p10 = scmp.lt.s32.totalorder %s866_s17, %s862_s14 }
 0x2b4   : > { %p864_p13 = pnand %p863_p9, %p1095_p0 }
 0x2b5   : > { %p869_p4 = por %p868_p10, %p867_p1 }
 0x2b6   : > { %p865_p11 = pneg %p864_p13 }
 0x2b8   : > { %p870_p8 = pnand %p869_p4, %p865_p11 }
 0x2ba   : > { %873 = shalt.err (!%p870_p8)
}
 0x2bb   : > { %682 = dma.vmem_to_hbm [thread:$0]  (%p1095_p0), %s1189_s9, 64, %s1187_s25, %s1195_s15  }
 0x2bc   : > { %s481_s12 = scalar_lea.hbm %s1269_s6, %s1148_s11  ;;  %s874_s24 = scalar_lea.vmem %s484_s28, 64 }
 0x2bd   : > { %p875_p12 = scmp.ne.s32.totalorder %s484_s28, %s874_s24  ;;  %s974_s29 = smov [#allocation10]  }
 0x2be   : > { %s878_s14 = sshll.u32 %s974_s29, 4  ;;  %s879_s14 = int_to_ptr.vmem [resolvable:$false] %s878_s14 }
 0x2bf   : > { %v427_v28 = vpop.permute.xlu1 %426  ;;  %p876_p3 = pnand %p875_p12, %p1095_p0  ;;  %s880_s16 = scalar_lea.vmem %s879_s14, 128 }
 0x2c0   : > { %429 = vst.msk [vmem:[%s320_s18] sm:$0xf] %vm416_vm2, %v427_v28  ;;  %p881_p7 = scmp.lt.s32.totalorder %s484_s28, %s879_s14  ;;  %p882_p2 = scmp.lt.s32.totalorder %s880_s16, %s874_s24 }
 0x2c1   : > { %p877_p5 = pneg %p876_p3 }
 0x2c2   : > { %p883_p6 = por %p882_p2, %p881_p7 }
 0x2c4   : > { %p884_p9 = pnand %p883_p6, %p877_p5 }
 0x2c6   : > { %887 = shalt.err (!%p884_p9)
}
 0x2c7   : > { %s888_s11 = scalar_lea.hbm %s481_s12, 64  ;;  %s892_s25 = scalar_lea.hbm %s1269_s6, 128 }
 0x2c8   : > { %p889_p13 = scmp.ne.s32.totalorder %s481_s12, %s888_s11  ;;  %p893_p10 = scmp.lt.s32.totalorder %s481_s12, %s1269_s6 }
 0x2c9   : > { %p894_p4 = scmp.lt.s32.totalorder %s892_s25, %s888_s11 }
 0x2ca   : > { %p890_p11 = pnand %p889_p13, %p1095_p0 }
 0x2cb   : > { %p895_p8 = por %p894_p4, %p893_p10 }
 0x2cc   : > { %p891_p1 = pneg %p890_p11 }
 0x2ce   : > { %p896_p12 = pnand %p895_p8, %p891_p1 }
 0x2d0   : > { %899 = shalt.err (!%p896_p12)
}
 0x2d1   : > { %683 = dma.vmem_to_hbm [thread:$0]  (%p1095_p0), %s484_s28, 64, %s481_s12, %s1195_s15  }
 0x2d2 PF: > { %s495_s17 = sand.u32 1, %s942_s21   ;;  %p1288_p3 = scmp.ne.s32.totalorder %s1277_s30, 0 }
 0x2d3   : > { %p1289_p5 = scmp.ge.s32.totalorder %s962_s26, 2  ;;  %s496_s8 = scalar_lea.sflag [#allocation4], %s495_s17 }
 0x2d5   : > { %p696_p7 = pnand %p1289_p5, %p1288_p3 }
 0x2d7   : > { %p697_p2 = pneg %p696_p7 }
 0x2d9   : > { %933 = dma.done.wait (%p697_p2), %s496_s8, 64  }
 0x2da   : > { %935 = vsyncadd (%p697_p2), %s496_s8, 4294967232  ;;  %s1290_s13 = sadd.s32 4294967294, %s962_s26  }
 0x2db   : > { %s504_s3 = sand.u32 1, %s1290_s13  }
 0x2dc   : > { %s505_s27 = scalar_lea.sflag [#allocation9], %s504_s3 }
 0x2dd   : > { %937 = dma.done.wait (%p697_p2), %s505_s27, 128  }
 0x2de   : > { %939 = vsyncadd (%p697_p2), %s505_s27, 4294967168  ;;  %s27_s26 = sadd.s32 1, %s962_s26   ;;  %s1291_s24 = sld [smem:[#allocation15_spill]] }
 0x2df   : > { %p24_p0 = scmp.ge.s32.totalorder %s27_s26, 4   ;;  %s1292_s25 = sld [smem:[#allocation16_spill]] }
 0x2e0   : > { %s1293_s21 = smov %s946_s22  ;;  %s1294_s22 = smov %s950_s23 }
 0x2e1   : > { %s1295_s23 = smov %s1104_s10  ;;  %26 = sbr.rel (!%p24_p0) target bundleno = 11 (0xb), region = 117 }
 0x2e6   :  { %519 = vsyncpa [#allocation3], 1 }
 0x2e7   :  { %521 = vsyncpa [#allocation3 + $0x1], 1 }
 0x2e8   :  { %522 = vsyncpa [#allocation6], 1 }
 0x2e9   :  { %523 = vsyncpa [#allocation4], 1 }
 0x2ea   :  { %525 = vsyncpa [#allocation4 + $0x1], 1 }
 0x2eb   :  { %526 = vsyncpa [#allocation9], 1 }
 0x2ec   :  { %528 = vsyncpa [#allocation9 + $0x1], 1 }

</bundles_post_ra>
